<compile_context>
chip_gen: v6e
topology: v6e:2x2x1
jax: 0.10.0
libtpu: 0.0.40
codegen_flags: <defaults>
</compile_context>

<pallas_src>
import functools
import math

import jax
import jax.numpy as jnp
from jax.experimental import pallas as pl
from jax.experimental.pallas import tpu as pltpu


def _round_up(v, m):
    return (v + m - 1) // m * m


def quantize_weight(w, nbits, symmetric):
    """Pure-JAX mirror of STE.forward (full-tensor affine quantization), in f32."""
    w = w.astype(jnp.float32)
    if nbits is None:
        return w
    if nbits == 0:
        return jnp.zeros_like(w)
    nonzero = w != 0.0
    if symmetric:
        max_value = jnp.max(jnp.abs(w))
        beta = -max_value
        alpha = max_value - beta
    else:
        wmax = jnp.max(w)
        beta = jnp.min(jnp.where(nonzero, w, wmax))   # min over non-zero entries
        alpha = wmax - beta
    # Guard alpha == 0 (all-zero or all-equal nonzero weights): result degenerates
    # to beta * mask instead of NaN.
    alpha_safe = jnp.where(alpha == 0.0, 1.0, alpha)
    step = float(2 ** nbits - 1)
    ws = (w - beta) / alpha_safe
    r = jnp.round(step * ws) * (1.0 / step)
    return jnp.where(nonzero, alpha * r + beta, 0.0)


def prepare_fp_linear_weight(weight, nbits, symmetric, *,
                             block_n=512, block_k=512,
                             compute_dtype=jnp.bfloat16):
    """One fused pass over W: quantize -> transpose to (K, N) -> pad -> cast.

    Since W is a parameter, the result can (and should) be cached across
    forward calls and passed to `fp_linear(..., prepared_weight=...)`.
    """
    N, K = weight.shape
    tn = min(block_n, _round_up(N, 128))
    tk = min(block_k, _round_up(K, 128))
    np_ = _round_up(N, tn)
    kp = _round_up(K, tk)
    wq = quantize_weight(weight, nbits, symmetric)            # f32 stats + affine
    wq_t = jnp.pad(wq.T, ((0, kp - K), (0, np_ - N))).astype(compute_dtype)
    return wq_t                                               # (kp, np_) compute_dtype


def _fp_linear_kernel(x_ref, wq_ref, b_ref, o_ref, acc_ref):
    """One (tm, tn) output tile, accumulated over the K grid axis.

    x_ref   : VMEM (tm, tk)  compute dtype (bf16)
    wq_ref  : VMEM (tk, tn)  compute dtype (bf16), pre-quantized, pre-transposed
    b_ref   : VMEM (1, tn)   f32
    o_ref   : VMEM (tm, tn)  out dtype
    acc_ref : VMEM (tm, tn)  f32 scratch accumulator
    """
    k = pl.program_id(2)

    @pl.when(k == 0)
    def _init():
        acc_ref[...] = jnp.zeros_like(acc_ref)

    # Pure MXU work: bf16 inputs, f32 accumulation, no casts / quantize in-kernel.
    acc_ref[...] += jnp.dot(x_ref[...], wq_ref[...],
                            preferred_element_type=jnp.float32)

    @pl.when(k == pl.num_programs(2) - 1)
    def _finalize():
        o_ref[...] = (acc_ref[...] + b_ref[...]).astype(o_ref.dtype)


def fp_linear(x, weight, bias, nbits=None, symmetric=False, *,
              block_m=512, block_n=512, block_k=512,
              compute_dtype=jnp.bfloat16, prepared_weight=None):
    """Forward pass of FP_Linear.

    x:      (B, in_features)              float32
    weight: (out_features, in_features)   float32 (PyTorch nn.Linear layout)
    bias:   (out_features,)               float32
    prepared_weight: optional output of prepare_fp_linear_weight (cached param).
    """
    B, K = x.shape
    N, K2 = weight.shape
    assert K == K2, (x.shape, weight.shape)
    out_dtype = x.dtype

    # nbits == 0  ->  y = x @ (0 * W).T + b = broadcast(b); skip the matmul entirely.
    if nbits == 0:
        return jnp.broadcast_to(bias.astype(out_dtype)[None, :], (B, N))

    # ---- tile sizes / padding to (8, 128)-aligned multiples ----
    tm = min(block_m, _round_up(B, 8))
    tn = min(block_n, _round_up(N, 128))
    tk = min(block_k, _round_up(K, 128))
    mp = _round_up(B, tm)
    np_ = _round_up(N, tn)
    kp = _round_up(K, tk)

    if prepared_weight is None:
        prepared_weight = prepare_fp_linear_weight(
            weight, nbits, symmetric,
            block_n=block_n, block_k=block_k, compute_dtype=compute_dtype)
    wq_t = prepared_weight
    assert wq_t.shape == (kp, np_) and wq_t.dtype == compute_dtype, (
        wq_t.shape, wq_t.dtype, (kp, np_), compute_dtype)

    x_p = jnp.pad(x, ((0, mp - B), (0, kp - K))).astype(compute_dtype)
    b_p = jnp.pad(bias.astype(jnp.float32), (0, np_ - N)).reshape(1, np_)

    # N-tiles lead the grid so small-batch shapes (mp//tm == 1) still expose a
    # multi-program parallel axis for megacore sharding; K (reduction) is last.
    grid = (np_ // tn, mp // tm, kp // tk)

    out = pl.pallas_call(
        _fp_linear_kernel,
        out_shape=jax.ShapeDtypeStruct((mp, np_), out_dtype),
        grid_spec=pltpu.PrefetchScalarGridSpec(
            num_scalar_prefetch=0,
            grid=grid,
            in_specs=[
                pl.BlockSpec((tm, tk), lambda j, i, k: (i, k)),   # x (bf16)
                pl.BlockSpec((tk, tn), lambda j, i, k: (k, j)),   # quantized W.T (bf16)
                pl.BlockSpec((1, tn), lambda j, i, k: (0, j)),    # bias (f32)
            ],
            out_specs=pl.BlockSpec((tm, tn), lambda j, i, k: (i, j)),
            scratch_shapes=[pltpu.VMEM((tm, tn), jnp.float32)],
        ),
        compiler_params=pltpu.CompilerParams(
            dimension_semantics=("parallel", "parallel", "arbitrary")),
    )(x_p, wq_t, b_p)

    return out[:B, :N]


if __name__ == "__main__":
    key = jax.random.PRNGKey(0)
    k_x, k_w, k_b = jax.random.split(key, 3)

    batch, in_features, out_features = 8, 256, 256
    nbits = 4

    # Deterministic parameter init matching FP_Linear.__init__:
    #   weight ~ Normal(0, sqrt(2 / (in + out))), bias ~ U(-1/sqrt(in), 1/sqrt(in))
    w_std = math.sqrt(2.0 / (in_features + out_features))
    weight = w_std * jax.random.normal(k_w, (out_features, in_features), dtype=jnp.float32)
    b_bound = 1.0 / math.sqrt(in_features)
    bias = jax.random.uniform(k_b, (out_features,), dtype=jnp.float32,
                              minval=-b_bound, maxval=b_bound)
    x = jax.random.normal(k_x, (batch, in_features), dtype=jnp.float32)

    def reference(nb, sym):
        wq = quantize_weight(weight, nb, sym)
        # Kernel feeds bf16 x and bf16 quantized W to the MXU with f32 accumulation;
        # mirror that rounding in the reference.
        x_bf = x.astype(jnp.bfloat16).astype(jnp.float32)
        wq_bf = wq.astype(jnp.bfloat16).astype(jnp.float32)
        return x_bf @ wq_bf.T + bias

    def check(nb, sym, **blocks):
        y = jax.block_until_ready(
            fp_linear(x, weight, bias, nbits=nb, symmetric=sym, **blocks))
        assert y.shape == (batch, out_features)
        y_ref = reference(nb, sym)
        err = float(jnp.max(jnp.abs(y - y_ref)))
        assert jnp.allclose(y, y_ref, atol=1e-3, rtol=1e-3), err

    # Small blocks so the (N, M, K) grid is actually exercised (2 x 1 x 2).
    small = dict(block_m=8, block_n=128, block_k=128)
    check(nbits, False, **small)   # asymmetric 4-bit quantization
    check(nbits, True, **small)    # symmetric 4-bit quantization
    check(None, False, **small)    # no quantization (plain linear)

    # Default 512-class blocks (collapse to full-array tiles at this size).
    check(nbits, False)
    check(nbits, True)
    check(None, False)

    # Cached pre-quantized weight path (one prep, reused across calls).
    wq_prepared = jax.block_until_ready(
        prepare_fp_linear_weight(weight, nbits, False))
    y_cached = jax.block_until_ready(
        fp_linear(x, weight, bias, nbits=nbits, symmetric=False,
                  prepared_weight=wq_prepared))
    assert jnp.allclose(y_cached, reference(nbits, False), atol=1e-3, rtol=1e-3)

    # nbits == 0: y = broadcast(bias), no matmul launched.
    y0 = jax.block_until_ready(fp_linear(x, weight, bias, nbits=0))
    assert jnp.allclose(y0, jnp.broadcast_to(bias, (batch, out_features)))

    print("KERNEL_OK")
</pallas_src>

<mosaic_0001>
module attributes {stable_mosaic.version = 11 : i64} {
  func.func @_fp_linear_kernel(%arg0: i32, %arg1: i32, %arg2: i32, %arg3: memref<8x128xbf16, #tpu.memory_space<vmem>>, %arg4: memref<128x128xbf16, #tpu.memory_space<vmem>>, %arg5: memref<1x128xf32, #tpu.memory_space<vmem>>, %arg6: memref<8x128xf32, #tpu.memory_space<vmem>>, %arg7: memref<8x128xf32, #tpu.memory_space<vmem>>) attributes {dimension_semantics = [#tpu.dimension_semantics<parallel>, #tpu.dimension_semantics<parallel>, #tpu.dimension_semantics<arbitrary>], iteration_bounds = array<i64: 2, 1, 2>, scalar_prefetch = 0 : i64, scratch_operands = 1 : i64, tpu.core_type = #tpu.core_type<tc>, window_params = [{transform_indices = @transform_0, window_bounds = array<i64: 8, 128>}, {transform_indices = @transform_1, window_bounds = array<i64: 128, 128>}, {transform_indices = @transform_2, window_bounds = array<i64: 1, 128>}, {transform_indices = @transform_3, window_bounds = array<i64: 8, 128>}]} {
    %c0_i32 = arith.constant 0 : i32
    %0 = arith.cmpi eq, %arg2, %c0_i32 : i32
    %1 = arith.extui %0 : i1 to i32
    %c0_i32_0 = arith.constant 0 : i32
    %2 = arith.cmpi ne, %1, %c0_i32_0 : i32
    scf.if %2 {
      %cst_9 = arith.constant 0.000000e+00 : f32
      %12 = vector.broadcast %cst_9 : f32 to vector<8x128xf32>
      %c0_10 = arith.constant 0 : index
      %c0_11 = arith.constant 0 : index
      %13 = vector.load %arg7[%c0_10, %c0_11] : memref<8x128xf32, #tpu.memory_space<vmem>>, vector<8x128xf32>
      tpu.vector_store %arg7[%c0_10, %c0_11], %12 {strides = array<i32>} : memref<8x128xf32, #tpu.memory_space<vmem>>, vector<8x128xf32>,
    } else {
    }
    %c0 = arith.constant 0 : index
    %c0_1 = arith.constant 0 : index
    %3 = vector.load %arg7[%c0, %c0_1] : memref<8x128xf32, #tpu.memory_space<vmem>>, vector<8x128xf32>
    %c0_2 = arith.constant 0 : index
    %c0_3 = arith.constant 0 : index
    %4 = vector.load %arg3[%c0_2, %c0_3] : memref<8x128xbf16, #tpu.memory_space<vmem>>, vector<8x128xbf16>
    %c0_4 = arith.constant 0 : index
    %c0_5 = arith.constant 0 : index
    %5 = vector.load %arg4[%c0_4, %c0_5] : memref<128x128xbf16, #tpu.memory_space<vmem>>, vector<128x128xbf16>
    %cst = arith.constant dense<0.000000e+00> : vector<8x128xf32>
    %6 = tpu.matmul %4, %5, %cst {dimension_numbers = #tpu.dot_dimension_numbers<[1], [0], [0], [1], [0, 0, 1, 1], [], []>} : vector<8x128xbf16>, vector<128x128xbf16>, vector<8x128xf32> -> vector<8x128xf32>
    %7 = arith.addf %3, %6 : vector<8x128xf32>
    %c0_6 = arith.constant 0 : index
    %c0_7 = arith.constant 0 : index
    %8 = vector.load %arg7[%c0_6, %c0_7] : memref<8x128xf32, #tpu.memory_space<vmem>>, vector<8x128xf32>
    tpu.vector_store %arg7[%c0_6, %c0_7], %7 {strides = array<i32>} : memref<8x128xf32, #tpu.memory_space<vmem>>, vector<8x128xf32>,
    %c1_i32 = arith.constant 1 : i32
    %9 = arith.cmpi eq, %arg2, %c1_i32 : i32
    %10 = arith.extui %9 : i1 to i32
    %c0_i32_8 = arith.constant 0 : i32
    %11 = arith.cmpi ne, %10, %c0_i32_8 : i32
    scf.if %11 {
      %c0_9 = arith.constant 0 : index
      %c0_10 = arith.constant 0 : index
      %12 = vector.load %arg7[%c0_9, %c0_10] : memref<8x128xf32, #tpu.memory_space<vmem>>, vector<8x128xf32>
      %c0_11 = arith.constant 0 : index
      %c0_12 = arith.constant 0 : index
      %13 = vector.load %arg5[%c0_11, %c0_12] : memref<1x128xf32, #tpu.memory_space<vmem>>, vector<1x128xf32>
      %14 = vector.broadcast %13 : vector<1x128xf32> to vector<8x128xf32>
      %15 = arith.addf %12, %14 : vector<8x128xf32>
      %c0_13 = arith.constant 0 : index
      %c0_14 = arith.constant 0 : index
      %16 = vector.load %arg6[%c0_13, %c0_14] : memref<8x128xf32, #tpu.memory_space<vmem>>, vector<8x128xf32>
      tpu.vector_store %arg6[%c0_13, %c0_14], %15 {strides = array<i32>} : memref<8x128xf32, #tpu.memory_space<vmem>>, vector<8x128xf32>,
    } else {
    }
    return
  }
  func.func @transform_0(%arg0: i32, %arg1: i32, %arg2: i32) -> (i32, i32) {
    %c0_i32 = arith.constant 0 : i32
    return %arg1, %arg2 : i32, i32
  }
  func.func @transform_1(%arg0: i32, %arg1: i32, %arg2: i32) -> (i32, i32) {
    %c0_i32 = arith.constant 0 : i32
    return %arg2, %arg0 : i32, i32
  }
  func.func @transform_2(%arg0: i32, %arg1: i32, %arg2: i32) -> (i32, i32) {
    %c0_i32 = arith.constant 0 : i32
    %c0_i32_0 = arith.constant 0 : i32
    return %c0_i32, %arg0 : i32, i32
  }
  func.func @transform_3(%arg0: i32, %arg1: i32, %arg2: i32) -> (i32, i32) {
    %c0_i32 = arith.constant 0 : i32
    return %arg1, %arg0 : i32, i32
  }
}

</mosaic_0001>

<bundles_post_ra>
// kernel: tpu_custom_call.1
= control target key start
LH: loop header
LB: loop body
LE: loop exit
PB: predicated region body
PF: predicated region fallthrough
CT: control target
= control target key end

     0   :  { %s1284_s0 = inlined_call_operand.hbm [shape: bf16[8,256], index: 0, kind: input, shape index: {}]   ;;  %s1285_s1 = inlined_call_operand.hbm [shape: bf16[256,256], index: 1, kind: input, shape index: {}]   ;;  %s1286_s2 = inlined_call_operand.vmem [shape: f32[1,256], index: 2, kind: input, shape index: {}]   ;;  %s1287_s3 = inlined_call_operand.hbm [shape: f32[8,256], index: 3, kind: output, shape index: {}]  }
   0x1   :  { %1296 = sst [smem:[#allocation21_spill]] %s1284_s0 }
   0x2   :  { %8 = vsyncpa [#allocation4], 0 }
   0x3   :  { %10 = vsyncpa [#allocation4 + $0x1], 0 }
   0x4   :  { %11 = vsyncpa [#allocation7], 0 }
   0x5   :  { %13 = vsyncpa [#allocation7 + $0x1], 0 }
   0x6   :  { %14 = vsyncpa [#allocation5], 0 }
   0x7   :  { %16 = vsyncpa [#allocation5 + $0x1], 0  ;;  %s975_s12 = smov 0   ;;  %s977_s13 = smov 0  }
   0x8   :  { %s979_s14 = smov 0   ;;  %s981_s15 = smov 0  }
   0x9   :  { %s983_s16 = smov 0   ;;  %s985_s17 = smov 0  }
   0xa   :  { %s987_s18 = smov 0   ;;  %s989_s19 = smov 0  }
   0xb   :  { %s991_s20 = smov 0   ;;  %s993_s21 = smov 0  }
   0xc   :  { %s995_s22 = smov 0   ;;  %s997_s23 = smov 0  }
   0xd   :  { %s999_s24 = smov 0   ;;  %s1001_s25 = smov 0  }
   0xe LB: > { %1297 = sst [smem:[#allocation12_spill]] %s900_s14  ;;  %s536_s26 = sadd.s32 4294967295, %s944_s25   ;;  %s944_s25 = sphi %s1001_s25, %s22_s25   ;;  %s940_s24 = sphi %s999_s24, %s1340_s24   ;;  %s936_s23 = sphi %s997_s23, %s1329_s23   ;;  %s932_s22 = sphi %s995_s22, %s1339_s22   ;;  %s928_s21 = sphi %s993_s21, %s1338_s21   ;;  %s924_s20 = sphi %s991_s20, %s1327_s20   ;;  %s920_s19 = sphi %s989_s19, %s1337_s19   ;;  %s916_s18 = sphi %s987_s18, %s1336_s18   ;;  %s912_s17 = sphi %s985_s17, %s1335_s17   ;;  %s908_s16 = sphi %s983_s16, %s1334_s16   ;;  %s904_s15 = sphi %s981_s15, %s1333_s15   ;;  %s900_s14 = sphi %s979_s14, %s1324_s14   ;;  %s896_s13 = sphi %s977_s13, %s1332_s13   ;;  %s892_s12 = sphi %s975_s12, %s1331_s12  }
   0xf   : > { %1298 = sst [smem:[#allocation13_spill]] %s924_s20  ;;  %s34_s28 = sadd.s32 1, %s936_s23 }
  0x10   : > { %1299 = sst [smem:[#allocation14_spill]] %s936_s23  ;;  %s41_s29 = sadd.s32 1, %s940_s24 }
  0x11   : > { %p35_p0 = scmp.ge.s32.totalorder %s34_s28, 2  ;;  %s50_s30 = sadd.s32 1, %s924_s20 }
  0x12   : > { %p57_p1 = scmp.ne.s32.totalorder %s924_s20, %s920_s19  ;;  %p58_p2 = scmp.eq.s32.totalorder %s944_s25, 0 }
  0x13   : > { %s1342_s28 = smov (%p35_p0, %s34_s28), 0  ;;  %s1344_s29 = smov (!%p35_p0, %s41_s29), %s940_s24 }
  0x14   : > { %1300 = sst [smem:[#allocation15_spill]] %s1342_s28  ;;  %s46_s4 = ssub.s32 %s936_s23, %s1342_s28 }
  0x15   : > { %p1058_p3 = por %p58_p2, %p57_p1  ;;  %p43_p4 = scmp.ge.s32.totalorder %s1344_s29, 2 }
  0x16   : > { %p48_p5 = scmp.eq.s32.totalorder %s46_s4, 0  ;;  %p63_p6 = scmp.ne.s32.totalorder %s920_s19, %s916_s18 }
  0x17   : > { %p1065_p7 = scmp.eq.s32.totalorder %s536_s26, 0  ;;  %s1346_s29 = smov (%p43_p4, %s1344_s29), 0 }
  0x18   : > { %1303 = sst [smem:[#allocation16_spill]] %s1346_s29  ;;  %s74_s9 = ssub.s32 %s940_s24, %s1346_s29 }
  0x19   : > { %s1072_s7 = scalar_select %p48_p5, %s924_s20, %s50_s30  }
  0x1a   : > { %p1076_p8 = por %p1065_p7, %p63_p6  ;;  %s75_s10 = sor.u32 %s74_s9, %s46_s4 }
  0x1b   : > { %1304 = sst [smem:[#allocation17_spill]] %s1072_s7  ;;  %s78_s11 = sadd.s32 1, %s912_s17 }
  0x1c   : > { %p76_p9 = scmp.eq.s32.totalorder %s75_s10, 0  ;;  %p85_p10 = scmp.ne.s32.totalorder %s912_s17, %s908_s16 }
  0x1d   : > { %p91_p11 = scmp.ne.s32.totalorder %s908_s16, %s904_s15  ;;  %p130_p12 = scmp.eq.s32.totalorder %s74_s9, 0 }
  0x1e   : > { %s1088_s18 = scalar_select %p76_p9, %s912_s17, %s78_s11  }
  0x1f   : > { %p1092_p13 = por %p85_p10, %p58_p2  ;;  %p1098_p0 = por %p91_p11, %p1065_p7 }
  0x20   : > { %1306 = sst [smem:[#allocation18_spill]] %s1088_s18  ;;  %s132_s4 = sadd.s32 1, %s900_s14 }
  0x21   : > { %s1308_s27 = scalar_select %p1098_p0, 1, 0 }
  0x22   : > { %p142_p1 = scmp.ne.s32.totalorder %s900_s14, %s896_s13  ;;  %p143_p4 = scmp.eq.s32.totalorder %s536_s26, 3 }
  0x23   : > { %s1106_s10 = scalar_select %p130_p12, %s900_s14, %s132_s4  }
  0x24   : > { %p148_p5 = scmp.ne.s32.totalorder %s896_s13, %s892_s12  ;;  %s1310_s15 = sadd.s32 4294967294, %s944_s25  }
  0x25   : > { %1309 = sst [smem:[#allocation19_spill]] %s1106_s10  ;;  %p149_p2 = scmp.eq.s32.totalorder %s1310_s15, 3 }
  0x26   : > { %p1114_p6 = por %p143_p4, %p142_p1  ;;  %p612_p7 = scmp.lt.s32.totalorder %s944_s25, 4 }
  0x27   : > { %p1119_p9 = por %p149_p2, %p148_p5  ;;  %s169_s11 = sand.u32 1, %s924_s20  }
  0x28   : > { %s1311_s9 = scalar_select %p1114_p6, 1, 0 }
  0x29   : > { %s1312_s6 = scalar_select %p1119_p9, 1, 0 }
  0x2a   : > { %s540_s29 = sshll.u32 %s169_s11, 2  ;;  %s541_s4 = sshll.u32 %s936_s23, 6 }
  0x2b   : > { %1313 = sst [smem:[#allocation20_spill]] %s1312_s6  ;;  %s173_s18 = scalar_lea.vmem [#allocation3], %s540_s29 }
  0x2c   : > { %s1314_s0 = sld [smem:[#allocation21_spill]]  ;;  %s182_s10 = sshll.u32 %s173_s18, 4  ;;  %s183_s10 = int_to_ptr.vmem [resolvable:$true] %s182_s10 }
  0x2d   : > { %p1130_p10 = pnand %p612_p7, %p1058_p3  ;;  %s565_s14 = sshll.u32 %s936_s23, 5 }
  0x2e   : > { %p1137_p11 = pnand %p612_p7, %p1092_p13  ;;  %p546_p12 = scmp.ge.s32.totalorder %s944_s25, 1 }
  0x2f   : > { %s170_s20 = scalar_lea.sflag [#allocation4], %s169_s11  ;;  %p742_p1 = pneg %p1130_p10 }
  0x30   : > { %s753_s28 = scalar_lea.vmem %s183_s10, 64  ;;  %s946_s29 = smov [#allocation3]  }
  0x31   : > { %p754_p4 = scmp.ne.s32.totalorder %s183_s10, %s753_s28  ;;  %s758_s5 = sshll.u32 %s946_s29, 4  ;;  %s759_s5 = int_to_ptr.vmem [resolvable:$false] %s758_s5 }
  0x32   : > { %s180_s26 = scalar_lea.hbm %s1314_s0, %s541_s4  ;;  %s760_s7 = scalar_lea.vmem %s759_s5, 128 }
  0x33   : > { %p756_p5 = pnand %p754_p4, %p742_p1  ;;  %p761_p3 = scmp.lt.s32.totalorder %s183_s10, %s759_s5 }
  0x34   : > { %p762_p9 = scmp.lt.s32.totalorder %s760_s7, %s753_s28 }
  0x35   : > { %p757_p2 = pneg %p756_p5 }
  0x36   : > { %p763_p6 = por %p762_p9, %p761_p3 }
  0x38   : > { %p764_p0 = pnand %p763_p6, %p757_p2 }
  0x3a   : > { %767 = shalt.err (!%p764_p0)
}
  0x3b   : > { %604 = dma.hbm_to_vmem [thread:$0]  (!%p1130_p10), %s180_s26, 64, %s183_s10, %s170_s20  }
  0x3c   : > { %p216_p13 = scmp.lt.s32.totalorder %s944_s25, 5  ;;  %s189_s18 = sand.u32 1, %s912_s17  }
  0x3d   : > { %s199_s30 = sadd.s32 %s940_s24, %s565_s14  ;;  %s542_s4 = sshll.u32 %s189_s18, 6 }
  0x3e   : > { %p1151_p7 = pnand %p546_p12, %p216_p13  ;;  %s545_s28 = sshll.u32 %s199_s30, 6 }
  0x3f   : > { %s201_s15 = scalar_lea.hbm %s1285_s1, %s545_s28  ;;  %s193_s7 = scalar_lea.vmem [#allocation6], %s542_s4 }
  0x40   : > { %s202_s0 = sshll.u32 %s193_s7, 4  ;;  %s190_s23 = scalar_lea.sflag [#allocation7], %s189_s18  ;;  %s203_s0 = int_to_ptr.vmem [resolvable:$true] %s202_s0 }
  0x41   : > { %p770_p0 = pneg %p1137_p11  ;;  %s781_s20 = scalar_lea.vmem %s203_s0, 1024 }
  0x42   : > { %p782_p6 = scmp.ne.s32.totalorder %s203_s0, %s781_s20  ;;  %s947_s14 = smov [#allocation6]  }
  0x43   : > { %s786_s10 = sshll.u32 %s947_s14, 4  ;;  %s787_s10 = int_to_ptr.vmem [resolvable:$false] %s786_s10 }
  0x44   : > { %p784_p9 = pnand %p782_p6, %p770_p0  ;;  %s788_s26 = scalar_lea.vmem %s787_s10, 2048 }
  0x45   : > { %p789_p12 = scmp.lt.s32.totalorder %s203_s0, %s787_s10  ;;  %p790_p1 = scmp.lt.s32.totalorder %s788_s26, %s781_s20 }
  0x46   : > { %p785_p10 = pneg %p784_p9 }
  0x47   : > { %p791_p4 = por %p790_p1, %p789_p12 }
  0x49   : > { %p792_p5 = pnand %p791_p4, %p785_p10 }
  0x4b   : > { %795 = shalt.err (!%p792_p5)
}
  0x4c   : > { %s948_s30 = smov 128   ;;  %s949_s4 = smov 64  }
  0x4d   : > { %s950_s28 = smov 4   ;;  %220 = sbr.rel (%p1151_p7) target bundleno = 360 (0x168), region = 32 }
  0x4e   : > { %607 = dma.hbm_to_vmem [thread:$0]  (!%p1137_p11), %s201_s15, 1024, %s203_s0, %s190_s23, %s948_s30, %s949_s4, %s950_s28  }
  0x4f   : > { %s222_s18 = sand.u32 (!%p1151_p7), 1, %s920_s19  }
  0x50   : > { %s1165_s29 = sshll.u32 (!%p1151_p7), %s222_s18, 2  ;;  %s223_s5 = scalar_lea.sflag (!%p1151_p7), [#allocation4], %s222_s18 }
  0x51   : > { %s226_s7 = scalar_lea.vmem (!%p1151_p7), [#allocation3], %s1165_s29 }
  0x52   : > { %879 = dma.done.wait (%p1076_p8), %s223_s5, 64  }
  0x53   : > { %881 = vsyncadd (%p1076_p8), %s223_s5, 4294967232  ;;  %s231_s6 = sand.u32 1, %s908_s16   ;;  %p1318_p11 = scmp.ne.s32.totalorder %s1308_s27, 0 }
  0x54   : > { %s548_s0 = sshll.u32 %s231_s6, 6  ;;  %s232_s23 = scalar_lea.sflag [#allocation7], %s231_s6 }
  0x55   : > { %s1173_s11 = scalar_lea.vmem [#allocation6], %s548_s0 }
  0x56   : > { %883 = dma.done.wait (%p1318_p11), %s232_s23, 1024  }
  0x57   : > { %885 = vsyncadd (%p1318_p11), %s232_s23, 4294966272  ;;  %s263_s15 = sand.u32 1, %s896_s13   ;;  %p267_p2 = scmp.lt.s32.totalorder %s932_s22, 1 }
  0x58   : > { %s1183_s8 = sshll.u32 %s263_s15, 3  ;;  %p550_p8 = scmp.ne.s32.totalorder %s928_s21, 0 }
  0x59   : > { %s1186_s20 = scalar_select %p267_p2, %s932_s22, 1 }
  0x5a   : > { %s265_s30 = scalar_lea.vmem [#allocation8], %s1183_s8  ;;  %274 = sbr.rel (%p550_p8) target bundleno = 97 (0x61), region = 44 }
  0x5b   : > { %s269_s26 = scalar_lea.vmem %s1286_s2, %s1186_s20 }
  0x5f   : > { %v951_v0 = vmov 0.0  }
  0x60   : > { %275 = vst [vmem:[#allocation2] sm:$0xff] %v951_v0 }
  0x61 PF: > { %v732_v1 = vld [vmem:[%s1173_s11 + $0x38] sm:$0xff]   ;;  %v952_v2 = vmov 0.0   ;;  %v733_v3 = vld [vmem:[%s1173_s11 + $0x30] sm:$0xff]   ;;  %vm953_vm0 = vmmov 0   ;;  %v734_v4 = vld [vmem:[%s1173_s11 + $0x28] sm:$0xff]   ;;  %p559_p3 = scmp.ne.s32.totalorder %s928_s21, 1 }
  0x62   : > { %575 = vmatprep.subr.bf16.mxu0 %v952_v2  ;;  %591 = vmatprep.mubr.msk.bf16.mxu0 %vm953_vm0, %v952_v2  ;;  %v735_v5 = vld [vmem:[%s1173_s11 + $0x20] sm:$0xff]   ;;  %v736_v6 = vld [vmem:[%s1173_s11 + $0x18] sm:$0xff]   ;;  %v737_v7 = vld [vmem:[%s1173_s11 + $0x10] sm:$0xff]  }
  0x63   : > { %576 = vmatpush3.bf16.msra.mxu0 %v732_v1  ;;  %v738_v8 = vld [vmem:[%s1173_s11 + $0x8] sm:$0xff]   ;;  %v739_v9 = vld [vmem:[%s1173_s11] sm:$0xff]   ;;  %v277_v10 = vld [vmem:[%s226_s7] sm:$0xf] }
  0x64   : > { %577 = vmatprep.subr.bf16.mxu0 %v952_v2 }
  0x67   : > { %578 = vmatpush3.bf16.msra.mxu0 %v733_v3  ;;  %v276_v11 = vld [vmem:[#allocation2] sm:$0xff] }
  0x68   : > { %579 = vmatprep.subr.bf16.mxu0 %v952_v2 }
  0x6b   : > { %580 = vmatpush3.bf16.msra.mxu0 %v734_v4 }
  0x6c   : > { %581 = vmatprep.subr.bf16.mxu0 %v952_v2 }
  0x6f   : > { %582 = vmatpush3.bf16.msra.mxu0 %v735_v5 }
  0x70   : > { %583 = vmatprep.subr.bf16.mxu0 %v952_v2 }
  0x73   : > { %584 = vmatpush3.bf16.msra.mxu0 %v736_v6 }
  0x74   : > { %585 = vmatprep.subr.bf16.mxu0 %v952_v2 }
  0x77   : > { %586 = vmatpush3.bf16.msra.mxu0 %v737_v7 }
  0x78   : > { %587 = vmatprep.subr.bf16.mxu0 %v952_v2 }
  0x7b   : > { %588 = vmatpush3.bf16.msra.mxu0 %v738_v8 }
  0x7c   : > { %589 = vmatprep.subr.bf16.mxu0 %v952_v2 }
  0x7f   : > { %590 = vmatpush3.bf16.msra.mxu0 %v739_v9 }
  0x82   : > { %592 = vmatmul.mubr.bf16.vlgmr.msra.gmra.mxu0 %v277_v10 }
 0x142   : > { %v376_v12 = vpop.f32.mrf.mxu0 }
 0x143   : > { %v382_v13 = vadd.f32 %v376_v12, %v276_v11 }
 0x144   : > { %v593_v14 = vpop.f32.mrf.mxu0  ;;  %387 = sbr.rel (%p559_p3) target bundleno = 336 (0x150), region = 48 }
 0x145   : > { %383 = vst [vmem:[#allocation2] sm:$0xff] %v382_v13 }
 0x146   : > { %v379_v15 = vpop.f32.mrf.mxu0 }
 0x148   : > { %v594_v16 = vpop.f32.mrf.mxu0 }
 0x149   : > { %v560_v18 = vld [vmem:[%s269_s26] ss:$0 sm:$0xff] }
 0x14c   : > { %v388_v17 = vld [vmem:[#allocation2] sm:$0xff] }
 0x14d   : > { %v396_v19 = vadd.f32 %v560_v18, %v388_v17 }
 0x14f   : > { %397 = vst [vmem:[%s265_s30] sm:$0xff] %v396_v19 }
 0x150 PF: > { %s562_s28 = sshll.u32 %s932_s22, 7  ;;  %s414_s5 = sshll.u32 %s265_s30, 4  ;;  %s415_s5 = int_to_ptr.vmem [resolvable:$true] %s414_s5 }
 0x151   : > { %s412_s29 = scalar_lea.hbm %s1287_s3, %s562_s28  ;;  %s399_s7 = scalar_lea.sflag [#allocation5], %s263_s15 }
 0x152   : > { %s796_s6 = scalar_lea.vmem %s415_s5, 128  ;;  %p1319_p7 = scmp.ne.s32.totalorder %s1311_s9, 0 }
 0x153   : > { %p797_p13 = scmp.ne.s32.totalorder %s415_s5, %s796_s6  ;;  %s954_s0 = smov [#allocation8]  }
 0x154   : > { %s800_s23 = sshll.u32 %s954_s0, 4  ;;  %s801_s23 = int_to_ptr.vmem [resolvable:$false] %s800_s23 }
 0x155   : > { %p798_p0 = pnand %p797_p13, %p1319_p7  ;;  %s802_s11 = scalar_lea.vmem %s801_s23, 256 }
 0x156   : > { %p803_p9 = scmp.lt.s32.totalorder %s415_s5, %s801_s23  ;;  %p804_p10 = scmp.lt.s32.totalorder %s802_s11, %s796_s6 }
 0x157   : > { %p799_p6 = pneg %p798_p0 }
 0x158   : > { %p805_p12 = por %p804_p10, %p803_p9 }
 0x15a   : > { %p806_p1 = pnand %p805_p12, %p799_p6 }
 0x15c   : > { %809 = shalt.err (!%p806_p1)
}
 0x15d   : > { %s810_s22 = scalar_lea.hbm %s412_s29, 128  ;;  %s814_s20 = scalar_lea.hbm %s1287_s3, 256 }
 0x15e   : > { %p811_p4 = scmp.ne.s32.totalorder %s412_s29, %s810_s22  ;;  %p815_p2 = scmp.lt.s32.totalorder %s412_s29, %s1287_s3 }
 0x15f   : > { %p816_p8 = scmp.lt.s32.totalorder %s814_s20, %s810_s22 }
 0x160   : > { %p812_p5 = pnand %p811_p4, %p1319_p7 }
 0x161   : > { %p817_p3 = por %p816_p8, %p815_p2 }
 0x162   : > { %p813_p11 = pneg %p812_p5 }
 0x164   : > { %p818_p13 = pnand %p817_p3, %p813_p11 }
 0x166   : > { %821 = shalt.err (!%p818_p13)
}
 0x167   : > { %599 = dma.vmem_to_hbm [thread:$0]  (%p1319_p7), %s415_s5, 128, %s412_s29, %s399_s7  }
 0x168 PF: > { %s1320_s26 = sld [smem:[#allocation20_spill]]  ;;  %p613_p0 = scmp.ge.s32.totalorder %s944_s25, 2 }
 0x169   : > { %s426_s30 = sand.u32 1, %s892_s12  }
 0x16a   : > { %s427_s27 = scalar_lea.sflag [#allocation5], %s426_s30 }
 0x16e   : > { %p1321_p6 = scmp.ne.s32.totalorder %s1320_s26, 0 }
 0x170   : > { %p609_p9 = pnand %p613_p0, %p1321_p6 }
 0x172   : > { %p610_p10 = pneg %p609_p9 }
 0x174   : > { %887 = dma.done.wait (%p610_p10), %s427_s27, 128  }
 0x175   : > { %889 = vsyncadd (%p610_p10), %s427_s27, 4294967168  ;;  %s22_s25 = sadd.s32 1, %s944_s25   ;;  %s1323_s9 = sld [smem:[#allocation12_spill]] }
 0x176   : > { %p1237_p12 = scmp.ge.s32.totalorder %s22_s25, 6   ;;  %s1324_s14 = sld [smem:[#allocation19_spill]] }
 0x177   : > { %s1325_s28 = sld [smem:[#allocation18_spill]]  ;;  %s1331_s12 = smov %s896_s13 }
 0x178   : > { %s1326_s21 = sld [smem:[#allocation13_spill]]  ;;  %s1333_s15 = smov %s908_s16 }
 0x179   : > { %s1327_s20 = sld [smem:[#allocation17_spill]]  ;;  %s1334_s16 = smov %s912_s17 }
 0x17a   : > { %s1328_s29 = sld [smem:[#allocation14_spill]]  ;;  %s1336_s18 = smov %s920_s19 }
 0x17b   : > { %s1329_s23 = sld [smem:[#allocation15_spill]]  ;;  %s1332_s13 = smov %s1323_s9 }
 0x17c   : > { %s1330_s5 = sld [smem:[#allocation16_spill]]  ;;  %s1339_s22 = smov %s940_s24 }
 0x17d   : > { %s1335_s17 = smov %s1325_s28 }
 0x17e   : > { %s1337_s19 = smov %s1326_s21  ;;  %21 = sbr.rel (!%p1237_p12) target bundleno = 14 (0xe), region = 101 }
 0x180   : > { %s1338_s21 = smov %s1328_s29 }
 0x182   : > { %s1340_s24 = smov %s1330_s5 }
 0x183   :  { %432 = vsyncpa [#allocation4], 1 }
 0x184   :  { %434 = vsyncpa [#allocation4 + $0x1], 1 }
 0x185   :  { %435 = vsyncpa [#allocation7], 1 }
 0x186   :  { %437 = vsyncpa [#allocation7 + $0x1], 1 }
 0x187   :  { %438 = vsyncpa [#allocation5], 1 }
 0x188   :  { %440 = vsyncpa [#allocation5 + $0x1], 1 }

</bundles_post_ra>
